<compile_context>
chip_gen: v7x
topology: tpu7x:2x2x1
jax: 0.10.0
libtpu: 0.0.40
codegen_flags: <defaults>
</compile_context>

<pallas_src>
import jax
import jax.numpy as jnp
from jax import lax
from jax.experimental import pallas as pl
from jax.experimental.pallas import tpu as pltpu


def _decoder_kernel(x_ref,    # (B, T, 2)        batch-first stroke input
                    z_ref,    # (B, Z)           latent
                    gp_ref,   # (H+Z+3, 4H)      packed: [Whh; Wz_fused; Wih_x; bias_fused]
                    fc_ref,   # (H+1, M)         packed: [Wfc; bfc]
                    out_ref): # (B, T, M)        batch-first output
    B, T, _ = x_ref.shape
    H = gp_ref.shape[1] // 4
    Z = z_ref.shape[1]
    M = fc_ref.shape[1]

    # Static views into the packed parameter slabs (no extra DMAs).
    whh   = gp_ref[0:H, :]                     # (H, 4H)
    wz_f  = gp_ref[H:H + Z, :]                 # (Z, 4H)   fused fc_z -> gate weight
    wih_x = gp_ref[H + Z:H + Z + 2, :]         # (2, 4H)
    bias  = gp_ref[H + Z + 2:H + Z + 3, :]     # (1, 4H)   fused bz@Wih_z + b_ih + b_hh

    # ---------- hoisted, time-invariant work (off the recurrence) ----------
    # Single matmul for the whole z path (folded offline) + combined biases.
    z_gate = jnp.dot(z_ref[...], wz_f,
                     preferred_element_type=jnp.float32) + bias           # (B, 4H)

    # x has only 2 features: its gate contribution for every timestep is two
    # rank-1 broadcast multiply-adds on the VPU (no K=2 MXU matmul).
    x_all = x_ref[...]                                                     # (B, T, 2)
    x_gate = (x_all[:, :, 0:1] * wih_x[0:1, :]
              + x_all[:, :, 1:2] * wih_x[1:2, :])                          # (B, T, 4H)
    gates_pre = x_gate + z_gate[:, None, :]                                # (B, T, 4H)

    # ---------- recurrence: fully unrolled, h/c carried in vregs ----------
    h = jnp.zeros((B, H), jnp.float32)
    c = jnp.zeros((B, H), jnp.float32)
    hs = []
    for t in range(T):  # static Python int -> full unroll at trace time
        gates = gates_pre[:, t, :] + jnp.dot(h, whh,
                                             preferred_element_type=jnp.float32)  # (B, 4H)
        # One sigmoid + one tanh over the full (B, 4H) vreg, gates are lane
        # slices (PyTorch order: i, f, g, o).  3 EUP pushes/step instead of 5.
        sig = jax.nn.sigmoid(gates)
        tnh = jnp.tanh(gates)
        i_g = sig[:, 0 * H:1 * H]
        f_g = sig[:, 1 * H:2 * H]
        g_g = tnh[:, 2 * H:3 * H]
        o_g = sig[:, 3 * H:4 * H]
        c = f_g * c + i_g * g_g
        h = o_g * jnp.tanh(c)
        hs.append(h)

    # ---------- single batched output projection + one store pass ---------
    wfc = fc_ref[0:H, :]                                                   # (H, M)
    bfc = fc_ref[H:H + 1, :]                                               # (1, M)
    h_all = jnp.stack(hs, axis=1).reshape(B * T, H)                        # (B*T, H)
    out = jnp.dot(h_all, wfc, preferred_element_type=jnp.float32)          # (B*T, M)
    out = out.reshape(B, T, M) + bfc[None, :, :]                           # (B, T, M)
    out_ref[...] = out.astype(out_ref.dtype)


@jax.jit
def decoder_forward(x, z, packed):
    """x: (B, T, 2) f32, z: (B, Z) f32 -> (B, T, M) f32.  No wrapper transposes."""
    B, T, _ = x.shape
    M = packed["fc_pack"].shape[1]

    vmem = pl.BlockSpec(memory_space=pltpu.MemorySpace.VMEM)
    return pl.pallas_call(
        _decoder_kernel,
        out_shape=jax.ShapeDtypeStruct((B, T, M), jnp.float32),
        in_specs=[vmem, vmem, vmem, vmem],
        out_specs=vmem,
    )(x, z, packed["gates_pack"], packed["fc_pack"])


def make_params(key, dec_rnn_size, num_mixture, z_size):
    """Synthetic PyTorch-shaped weights, plus offline folding/packing for the kernel."""
    H, M, Z = dec_rnn_size, num_mixture, z_size
    ks = jax.random.split(key, 8)
    scale = 0.1
    # PyTorch shapes: fc_z.weight (H, Z); lstm.weight_ih_l0 (4H, 2+H);
    # lstm.weight_hh_l0 (4H, H); fc.weight (M, H).
    w_fc_z = scale * jax.random.normal(ks[0], (H, Z), jnp.float32)
    b_fc_z = scale * jax.random.normal(ks[1], (H,), jnp.float32)
    w_ih   = scale * jax.random.normal(ks[2], (4 * H, 2 + H), jnp.float32)
    w_hh   = scale * jax.random.normal(ks[3], (4 * H, H), jnp.float32)
    b_ih   = scale * jax.random.normal(ks[4], (4 * H,), jnp.float32)
    b_hh   = scale * jax.random.normal(ks[5], (4 * H,), jnp.float32)
    w_fc   = scale * jax.random.normal(ks[6], (M, H), jnp.float32)
    b_fc   = scale * jax.random.normal(ks[7], (M,), jnp.float32)

    # Right-multiply (transposed) forms.
    wz_t  = w_fc_z.T                 # (Z, H)
    wih_t = w_ih.T                   # (2+H, 4H)
    whh_t = w_hh.T                   # (H, 4H)
    wfc_t = w_fc.T                   # (H, M)
    wih_x = wih_t[:2, :]             # (2, 4H)
    wih_z = wih_t[2:, :]             # (H, 4H)

    # Offline z-path folding: z_gate = z @ (Wz @ Wih_z) + (bz @ Wih_z + b_ih + b_hh).
    wz_fused   = wz_t @ wih_z                          # (Z, 4H)
    bias_fused = b_fc_z @ wih_z + b_ih + b_hh          # (4H,)

    # Two packed, lane-dense parameter slabs (2 DMAs instead of 8).
    gates_pack = jnp.concatenate(
        [whh_t, wz_fused, wih_x, bias_fused[None, :]], axis=0)  # (H+Z+3, 4H)
    fc_pack = jnp.concatenate([wfc_t, b_fc[None, :]], axis=0)   # (H+1, M)

    packed = {"gates_pack": gates_pack, "fc_pack": fc_pack}
    raw = {"wz_t": wz_t, "bz": b_fc_z[None, :], "wih_t": wih_t, "whh_t": whh_t,
           "b_ih": b_ih[None, :], "b_hh": b_hh[None, :],
           "wfc_t": wfc_t, "bfc": b_fc[None, :]}
    return packed, raw


def decoder_reference(x, z, raw):
    """Pure-JAX reference with the UNFUSED weights (validates the offline folding too)."""
    H = raw["whh_t"].shape[0]
    B = x.shape[0]
    z_proj = z @ raw["wz_t"] + raw["bz"]                 # (B, H)

    def step(carry, x_t):
        h, c = carry
        inp = jnp.concatenate([x_t, z_proj], axis=-1)    # (B, 2+H)
        gates = inp @ raw["wih_t"] + h @ raw["whh_t"] + raw["b_ih"] + raw["b_hh"]
        i = jax.nn.sigmoid(gates[:, 0 * H:1 * H])
        f = jax.nn.sigmoid(gates[:, 1 * H:2 * H])
        g = jnp.tanh(gates[:, 2 * H:3 * H])
        o = jax.nn.sigmoid(gates[:, 3 * H:4 * H])
        c = f * c + i * g
        h = o * jnp.tanh(c)
        return (h, c), h @ raw["wfc_t"] + raw["bfc"]

    carry0 = (jnp.zeros((B, H), jnp.float32), jnp.zeros((B, H), jnp.float32))
    _, ys = lax.scan(step, carry0, jnp.transpose(x, (1, 0, 2)))
    return jnp.transpose(ys, (1, 0, 2))


if __name__ == "__main__":
    # Small shapes consistent with the module's forward:
    #   x: (B, T, 2) stroke deltas, z: (B, z_size) latent.
    B, T = 2, 8
    DEC_RNN_SIZE = 32     # hidden size H  (4H = 128 -> lane-dense gate slab)
    NUM_MIXTURE = 20      # output size M
    Z_SIZE = 16

    key = jax.random.PRNGKey(0)
    k_x, k_z, k_p = jax.random.split(key, 3)

    x = jax.random.normal(k_x, (B, T, 2), jnp.float32)
    z = jax.random.normal(k_z, (B, Z_SIZE), jnp.float32)
    packed, raw = make_params(k_p, DEC_RNN_SIZE, NUM_MIXTURE, Z_SIZE)

    out = decoder_forward(x, z, packed)
    out = jax.block_until_ready(out)

    ref = decoder_reference(x, z, raw)
    assert out.shape == (B, T, NUM_MIXTURE)
    assert jnp.allclose(out, ref, atol=1e-4, rtol=1e-4), "mismatch vs JAX reference"

    print("KERNEL_OK")
</pallas_src>

<mosaic_0001>
module attributes {stable_mosaic.version = 11 : i64} {
  func.func @_decoder_kernel(%arg0: memref<2x8x2xf32, #tpu.memory_space<vmem>>, %arg1: memref<2x16xf32, #tpu.memory_space<vmem>>, %arg2: memref<51x128xf32, #tpu.memory_space<vmem>>, %arg3: memref<33x20xf32, #tpu.memory_space<vmem>>, %arg4: memref<2x8x20xf32, #tpu.memory_space<vmem>>) attributes {dimension_semantics = [], scalar_prefetch = 0 : i64, scratch_operands = 0 : i64, tpu.core_type = #tpu.core_type<tc>} {
    %c0 = arith.constant 0 : index
    %c0_0 = arith.constant 0 : index
    %0 = vector.load %arg2[%c0, %c0_0] : memref<51x128xf32, #tpu.memory_space<vmem>>, vector<32x128xf32>
    %c32 = arith.constant 32 : index
    %c0_1 = arith.constant 0 : index
    %1 = vector.load %arg2[%c32, %c0_1] : memref<51x128xf32, #tpu.memory_space<vmem>>, vector<16x128xf32>
    %c48 = arith.constant 48 : index
    %c0_2 = arith.constant 0 : index
    %2 = vector.load %arg2[%c48, %c0_2] : memref<51x128xf32, #tpu.memory_space<vmem>>, vector<2x128xf32>
    %c50 = arith.constant 50 : index
    %c0_3 = arith.constant 0 : index
    %3 = vector.load %arg2[%c50, %c0_3] : memref<51x128xf32, #tpu.memory_space<vmem>>, vector<1x128xf32>
    %c0_4 = arith.constant 0 : index
    %c0_5 = arith.constant 0 : index
    %4 = vector.load %arg1[%c0_4, %c0_5] : memref<2x16xf32, #tpu.memory_space<vmem>>, vector<2x16xf32>
    %cst = arith.constant dense<0.000000e+00> : vector<2x128xf32>
    %5 = tpu.matmul %4, %1, %cst {dimension_numbers = #tpu.dot_dimension_numbers<[1], [0], [0], [1], [0, 0, 1, 1], [], []>} : vector<2x16xf32>, vector<16x128xf32>, vector<2x128xf32> -> vector<2x128xf32>
    %6 = vector.broadcast %3 : vector<1x128xf32> to vector<2x128xf32>
    %7 = arith.addf %5, %6 : vector<2x128xf32>
    %c0_6 = arith.constant 0 : index
    %c0_7 = arith.constant 0 : index
    %c0_8 = arith.constant 0 : index
    %8 = vector.load %arg0[%c0_6, %c0_7, %c0_8] : memref<2x8x2xf32, #tpu.memory_space<vmem>>, vector<2x8x2xf32>
    %9 = vector.extract_strided_slice %8 {offsets = [0, 0, 0], sizes = [2, 8, 1], strides = [1, 1, 1]} : vector<2x8x2xf32> to vector<2x8x1xf32>
    %10 = vector.extract_strided_slice %2 {offsets = [0, 0], sizes = [1, 128], strides = [1, 1]} : vector<2x128xf32> to vector<1x128xf32>
    %11 = vector.shape_cast %10 : vector<1x128xf32> to vector<1x1x128xf32>
    %12 = vector.broadcast %9 : vector<2x8x1xf32> to vector<2x8x128xf32>
    %13 = vector.broadcast %11 : vector<1x1x128xf32> to vector<2x8x128xf32>
    %14 = arith.mulf %12, %13 : vector<2x8x128xf32>
    %15 = vector.extract_strided_slice %8 {offsets = [0, 0, 1], sizes = [2, 8, 1], strides = [1, 1, 1]} : vector<2x8x2xf32> to vector<2x8x1xf32>
    %16 = vector.extract_strided_slice %2 {offsets = [1, 0], sizes = [1, 128], strides = [1, 1]} : vector<2x128xf32> to vector<1x128xf32>
    %17 = vector.shape_cast %16 : vector<1x128xf32> to vector<1x1x128xf32>
    %18 = vector.broadcast %15 : vector<2x8x1xf32> to vector<2x8x128xf32>
    %19 = vector.broadcast %17 : vector<1x1x128xf32> to vector<2x8x128xf32>
    %20 = arith.mulf %18, %19 : vector<2x8x128xf32>
    %21 = arith.addf %14, %20 : vector<2x8x128xf32>
    %22 = vector.shape_cast %7 : vector<2x128xf32> to vector<2x1x128xf32>
    %23 = vector.broadcast %22 : vector<2x1x128xf32> to vector<2x8x128xf32>
    %24 = arith.addf %21, %23 : vector<2x8x128xf32>
    %cst_9 = arith.constant 0.000000e+00 : f32
    %25 = vector.broadcast %cst_9 : f32 to vector<2x32xf32>
    %cst_10 = arith.constant 0.000000e+00 : f32
    %26 = vector.broadcast %cst_10 : f32 to vector<2x32xf32>
    %27 = vector.extract_strided_slice %24 {offsets = [0, 0, 0], sizes = [2, 1, 128], strides = [1, 1, 1]} : vector<2x8x128xf32> to vector<2x1x128xf32>
    %28 = vector.shape_cast %27 : vector<2x1x128xf32> to vector<2x128xf32>
    %cst_11 = arith.constant dense<0.000000e+00> : vector<2x128xf32>
    %29 = tpu.matmul %25, %0, %cst_11 {dimension_numbers = #tpu.dot_dimension_numbers<[1], [0], [0], [1], [0, 0, 1, 1], [], []>} : vector<2x32xf32>, vector<32x128xf32>, vector<2x128xf32> -> vector<2x128xf32>
    %30 = arith.addf %28, %29 : vector<2x128xf32>
    %31 = arith.negf %30 : vector<2x128xf32>
    %32 = math.exp %31 : vector<2x128xf32>
    %cst_12 = arith.constant 1.000000e+00 : f32
    %33 = vector.broadcast %cst_12 : f32 to vector<2x128xf32>
    %34 = arith.addf %33, %32 : vector<2x128xf32>
    %35 = arith.divf %33, %34 : vector<2x128xf32>
    %36 = math.tanh %30 : vector<2x128xf32>
    %37 = vector.extract_strided_slice %35 {offsets = [0, 0], sizes = [2, 32], strides = [1, 1]} : vector<2x128xf32> to vector<2x32xf32>
    %38 = vector.extract_strided_slice %35 {offsets = [0, 32], sizes = [2, 32], strides = [1, 1]} : vector<2x128xf32> to vector<2x32xf32>
    %39 = vector.extract_strided_slice %36 {offsets = [0, 64], sizes = [2, 32], strides = [1, 1]} : vector<2x128xf32> to vector<2x32xf32>
    %40 = vector.extract_strided_slice %35 {offsets = [0, 96], sizes = [2, 32], strides = [1, 1]} : vector<2x128xf32> to vector<2x32xf32>
    %41 = arith.mulf %38, %26 : vector<2x32xf32>
    %42 = arith.mulf %37, %39 : vector<2x32xf32>
    %43 = arith.addf %41, %42 : vector<2x32xf32>
    %44 = math.tanh %43 : vector<2x32xf32>
    %45 = arith.mulf %40, %44 : vector<2x32xf32>
    %46 = vector.extract_strided_slice %24 {offsets = [0, 1, 0], sizes = [2, 1, 128], strides = [1, 1, 1]} : vector<2x8x128xf32> to vector<2x1x128xf32>
    %47 = vector.shape_cast %46 : vector<2x1x128xf32> to vector<2x128xf32>
    %cst_13 = arith.constant dense<0.000000e+00> : vector<2x128xf32>
    %48 = tpu.matmul %45, %0, %cst_13 {dimension_numbers = #tpu.dot_dimension_numbers<[1], [0], [0], [1], [0, 0, 1, 1], [], []>} : vector<2x32xf32>, vector<32x128xf32>, vector<2x128xf32> -> vector<2x128xf32>
    %49 = arith.addf %47, %48 : vector<2x128xf32>
    %50 = arith.negf %49 : vector<2x128xf32>
    %51 = math.exp %50 : vector<2x128xf32>
    %cst_14 = arith.constant 1.000000e+00 : f32
    %52 = vector.broadcast %cst_14 : f32 to vector<2x128xf32>
    %53 = arith.addf %52, %51 : vector<2x128xf32>
    %54 = arith.divf %52, %53 : vector<2x128xf32>
    %55 = math.tanh %49 : vector<2x128xf32>
    %56 = vector.extract_strided_slice %54 {offsets = [0, 0], sizes = [2, 32], strides = [1, 1]} : vector<2x128xf32> to vector<2x32xf32>
    %57 = vector.extract_strided_slice %54 {offsets = [0, 32], sizes = [2, 32], strides = [1, 1]} : vector<2x128xf32> to vector<2x32xf32>
    %58 = vector.extract_strided_slice %55 {offsets = [0, 64], sizes = [2, 32], strides = [1, 1]} : vector<2x128xf32> to vector<2x32xf32>
    %59 = vector.extract_strided_slice %54 {offsets = [0, 96], sizes = [2, 32], strides = [1, 1]} : vector<2x128xf32> to vector<2x32xf32>
    %60 = arith.mulf %57, %43 : vector<2x32xf32>
    %61 = arith.mulf %56, %58 : vector<2x32xf32>
    %62 = arith.addf %60, %61 : vector<2x32xf32>
    %63 = math.tanh %62 : vector<2x32xf32>
    %64 = arith.mulf %59, %63 : vector<2x32xf32>
    %65 = vector.extract_strided_slice %24 {offsets = [0, 2, 0], sizes = [2, 1, 128], strides = [1, 1, 1]} : vector<2x8x128xf32> to vector<2x1x128xf32>
    %66 = vector.shape_cast %65 : vector<2x1x128xf32> to vector<2x128xf32>
    %cst_15 = arith.constant dense<0.000000e+00> : vector<2x128xf32>
    %67 = tpu.matmul %64, %0, %cst_15 {dimension_numbers = #tpu.dot_dimension_numbers<[1], [0], [0], [1], [0, 0, 1, 1], [], []>} : vector<2x32xf32>, vector<32x128xf32>, vector<2x128xf32> -> vector<2x128xf32>
    %68 = arith.addf %66, %67 : vector<2x128xf32>
    %69 = arith.negf %68 : vector<2x128xf32>
    %70 = math.exp %69 : vector<2x128xf32>
    %cst_16 = arith.constant 1.000000e+00 : f32
    %71 = vector.broadcast %cst_16 : f32 to vector<2x128xf32>
    %72 = arith.addf %71, %70 : vector<2x128xf32>
    %73 = arith.divf %71, %72 : vector<2x128xf32>
    %74 = math.tanh %68 : vector<2x128xf32>
    %75 = vector.extract_strided_slice %73 {offsets = [0, 0], sizes = [2, 32], strides = [1, 1]} : vector<2x128xf32> to vector<2x32xf32>
    %76 = vector.extract_strided_slice %73 {offsets = [0, 32], sizes = [2, 32], strides = [1, 1]} : vector<2x128xf32> to vector<2x32xf32>
    %77 = vector.extract_strided_slice %74 {offsets = [0, 64], sizes = [2, 32], strides = [1, 1]} : vector<2x128xf32> to vector<2x32xf32>
    %78 = vector.extract_strided_slice %73 {offsets = [0, 96], sizes = [2, 32], strides = [1, 1]} : vector<2x128xf32> to vector<2x32xf32>
    %79 = arith.mulf %76, %62 : vector<2x32xf32>
    %80 = arith.mulf %75, %77 : vector<2x32xf32>
    %81 = arith.addf %79, %80 : vector<2x32xf32>
    %82 = math.tanh %81 : vector<2x32xf32>
    %83 = arith.mulf %78, %82 : vector<2x32xf32>
    %84 = vector.extract_strided_slice %24 {offsets = [0, 3, 0], sizes = [2, 1, 128], strides = [1, 1, 1]} : vector<2x8x128xf32> to vector<2x1x128xf32>
    %85 = vector.shape_cast %84 : vector<2x1x128xf32> to vector<2x128xf32>
    %cst_17 = arith.constant dense<0.000000e+00> : vector<2x128xf32>
    %86 = tpu.matmul %83, %0, %cst_17 {dimension_numbers = #tpu.dot_dimension_numbers<[1], [0], [0], [1], [0, 0, 1, 1], [], []>} : vector<2x32xf32>, vector<32x128xf32>, vector<2x128xf32> -> vector<2x128xf32>
    %87 = arith.addf %85, %86 : vector<2x128xf32>
    %88 = arith.negf %87 : vector<2x128xf32>
    %89 = math.exp %88 : vector<2x128xf32>
    %cst_18 = arith.constant 1.000000e+00 : f32
    %90 = vector.broadcast %cst_18 : f32 to vector<2x128xf32>
    %91 = arith.addf %90, %89 : vector<2x128xf32>
    %92 = arith.divf %90, %91 : vector<2x128xf32>
    %93 = math.tanh %87 : vector<2x128xf32>
    %94 = vector.extract_strided_slice %92 {offsets = [0, 0], sizes = [2, 32], strides = [1, 1]} : vector<2x128xf32> to vector<2x32xf32>
    %95 = vector.extract_strided_slice %92 {offsets = [0, 32], sizes = [2, 32], strides = [1, 1]} : vector<2x128xf32> to vector<2x32xf32>
    %96 = vector.extract_strided_slice %93 {offsets = [0, 64], sizes = [2, 32], strides = [1, 1]} : vector<2x128xf32> to vector<2x32xf32>
    %97 = vector.extract_strided_slice %92 {offsets = [0, 96], sizes = [2, 32], strides = [1, 1]} : vector<2x128xf32> to vector<2x32xf32>
    %98 = arith.mulf %95, %81 : vector<2x32xf32>
    %99 = arith.mulf %94, %96 : vector<2x32xf32>
    %100 = arith.addf %98, %99 : vector<2x32xf32>
    %101 = math.tanh %100 : vector<2x32xf32>
    %102 = arith.mulf %97, %101 : vector<2x32xf32>
    %103 = vector.extract_strided_slice %24 {offsets = [0, 4, 0], sizes = [2, 1, 128], strides = [1, 1, 1]} : vector<2x8x128xf32> to vector<2x1x128xf32>
    %104 = vector.shape_cast %103 : vector<2x1x128xf32> to vector<2x128xf32>
    %cst_19 = arith.constant dense<0.000000e+00> : vector<2x128xf32>
    %105 = tpu.matmul %102, %0, %cst_19 {dimension_numbers = #tpu.dot_dimension_numbers<[1], [0], [0], [1], [0, 0, 1, 1], [], []>} : vector<2x32xf32>, vector<32x128xf32>, vector<2x128xf32> -> vector<2x128xf32>
    %106 = arith.addf %104, %105 : vector<2x128xf32>
    %107 = arith.negf %106 : vector<2x128xf32>
    %108 = math.exp %107 : vector<2x128xf32>
    %cst_20 = arith.constant 1.000000e+00 : f32
    %109 = vector.broadcast %cst_20 : f32 to vector<2x128xf32>
    %110 = arith.addf %109, %108 : vector<2x128xf32>
    %111 = arith.divf %109, %110 : vector<2x128xf32>
    %112 = math.tanh %106 : vector<2x128xf32>
    %113 = vector.extract_strided_slice %111 {offsets = [0, 0], sizes = [2, 32], strides = [1, 1]} : vector<2x128xf32> to vector<2x32xf32>
    %114 = vector.extract_strided_slice %111 {offsets = [0, 32], sizes = [2, 32], strides = [1, 1]} : vector<2x128xf32> to vector<2x32xf32>
    %115 = vector.extract_strided_slice %112 {offsets = [0, 64], sizes = [2, 32], strides = [1, 1]} : vector<2x128xf32> to vector<2x32xf32>
    %116 = vector.extract_strided_slice %111 {offsets = [0, 96], sizes = [2, 32], strides = [1, 1]} : vector<2x128xf32> to vector<2x32xf32>
    %117 = arith.mulf %114, %100 : vector<2x32xf32>
    %118 = arith.mulf %113, %115 : vector<2x32xf32>
    %119 = arith.addf %117, %118 : vector<2x32xf32>
    %120 = math.tanh %119 : vector<2x32xf32>
    %121 = arith.mulf %116, %120 : vector<2x32xf32>
    %122 = vector.extract_strided_slice %24 {offsets = [0, 5, 0], sizes = [2, 1, 128], strides = [1, 1, 1]} : vector<2x8x128xf32> to vector<2x1x128xf32>
    %123 = vector.shape_cast %122 : vector<2x1x128xf32> to vector<2x128xf32>
    %cst_21 = arith.constant dense<0.000000e+00> : vector<2x128xf32>
    %124 = tpu.matmul %121, %0, %cst_21 {dimension_numbers = #tpu.dot_dimension_numbers<[1], [0], [0], [1], [0, 0, 1, 1], [], []>} : vector<2x32xf32>, vector<32x128xf32>, vector<2x128xf32> -> vector<2x128xf32>
    %125 = arith.addf %123, %124 : vector<2x128xf32>
    %126 = arith.negf %125 : vector<2x128xf32>
    %127 = math.exp %126 : vector<2x128xf32>
    %cst_22 = arith.constant 1.000000e+00 : f32
    %128 = vector.broadcast %cst_22 : f32 to vector<2x128xf32>
    %129 = arith.addf %128, %127 : vector<2x128xf32>
    %130 = arith.divf %128, %129 : vector<2x128xf32>
    %131 = math.tanh %125 : vector<2x128xf32>
    %132 = vector.extract_strided_slice %130 {offsets = [0, 0], sizes = [2, 32], strides = [1, 1]} : vector<2x128xf32> to vector<2x32xf32>
    %133 = vector.extract_strided_slice %130 {offsets = [0, 32], sizes = [2, 32], strides = [1, 1]} : vector<2x128xf32> to vector<2x32xf32>
    %134 = vector.extract_strided_slice %131 {offsets = [0, 64], sizes = [2, 32], strides = [1, 1]} : vector<2x128xf32> to vector<2x32xf32>
    %135 = vector.extract_strided_slice %130 {offsets = [0, 96], sizes = [2, 32], strides = [1, 1]} : vector<2x128xf32> to vector<2x32xf32>
    %136 = arith.mulf %133, %119 : vector<2x32xf32>
    %137 = arith.mulf %132, %134 : vector<2x32xf32>
    %138 = arith.addf %136, %137 : vector<2x32xf32>
    %139 = math.tanh %138 : vector<2x32xf32>
    %140 = arith.mulf %135, %139 : vector<2x32xf32>
    %141 = vector.extract_strided_slice %24 {offsets = [0, 6, 0], sizes = [2, 1, 128], strides = [1, 1, 1]} : vector<2x8x128xf32> to vector<2x1x128xf32>
    %142 = vector.shape_cast %141 : vector<2x1x128xf32> to vector<2x128xf32>
    %cst_23 = arith.constant dense<0.000000e+00> : vector<2x128xf32>
    %143 = tpu.matmul %140, %0, %cst_23 {dimension_numbers = #tpu.dot_dimension_numbers<[1], [0], [0], [1], [0, 0, 1, 1], [], []>} : vector<2x32xf32>, vector<32x128xf32>, vector<2x128xf32> -> vector<2x128xf32>
    %144 = arith.addf %142, %143 : vector<2x128xf32>
    %145 = arith.negf %144 : vector<2x128xf32>
    %146 = math.exp %145 : vector<2x128xf32>
    %cst_24 = arith.constant 1.000000e+00 : f32
    %147 = vector.broadcast %cst_24 : f32 to vector<2x128xf32>
    %148 = arith.addf %147, %146 : vector<2x128xf32>
    %149 = arith.divf %147, %148 : vector<2x128xf32>
    %150 = math.tanh %144 : vector<2x128xf32>
    %151 = vector.extract_strided_slice %149 {offsets = [0, 0], sizes = [2, 32], strides = [1, 1]} : vector<2x128xf32> to vector<2x32xf32>
    %152 = vector.extract_strided_slice %149 {offsets = [0, 32], sizes = [2, 32], strides = [1, 1]} : vector<2x128xf32> to vector<2x32xf32>
    %153 = vector.extract_strided_slice %150 {offsets = [0, 64], sizes = [2, 32], strides = [1, 1]} : vector<2x128xf32> to vector<2x32xf32>
    %154 = vector.extract_strided_slice %149 {offsets = [0, 96], sizes = [2, 32], strides = [1, 1]} : vector<2x128xf32> to vector<2x32xf32>
    %155 = arith.mulf %152, %138 : vector<2x32xf32>
    %156 = arith.mulf %151, %153 : vector<2x32xf32>
    %157 = arith.addf %155, %156 : vector<2x32xf32>
    %158 = math.tanh %157 : vector<2x32xf32>
    %159 = arith.mulf %154, %158 : vector<2x32xf32>
    %160 = vector.extract_strided_slice %24 {offsets = [0, 7, 0], sizes = [2, 1, 128], strides = [1, 1, 1]} : vector<2x8x128xf32> to vector<2x1x128xf32>
    %161 = vector.shape_cast %160 : vector<2x1x128xf32> to vector<2x128xf32>
    %cst_25 = arith.constant dense<0.000000e+00> : vector<2x128xf32>
    %162 = tpu.matmul %159, %0, %cst_25 {dimension_numbers = #tpu.dot_dimension_numbers<[1], [0], [0], [1], [0, 0, 1, 1], [], []>} : vector<2x32xf32>, vector<32x128xf32>, vector<2x128xf32> -> vector<2x128xf32>
    %163 = arith.addf %161, %162 : vector<2x128xf32>
    %164 = arith.negf %163 : vector<2x128xf32>
    %165 = math.exp %164 : vector<2x128xf32>
    %cst_26 = arith.constant 1.000000e+00 : f32
    %166 = vector.broadcast %cst_26 : f32 to vector<2x128xf32>
    %167 = arith.addf %166, %165 : vector<2x128xf32>
    %168 = arith.divf %166, %167 : vector<2x128xf32>
    %169 = math.tanh %163 : vector<2x128xf32>
    %170 = vector.extract_strided_slice %168 {offsets = [0, 0], sizes = [2, 32], strides = [1, 1]} : vector<2x128xf32> to vector<2x32xf32>
    %171 = vector.extract_strided_slice %168 {offsets = [0, 32], sizes = [2, 32], strides = [1, 1]} : vector<2x128xf32> to vector<2x32xf32>
    %172 = vector.extract_strided_slice %169 {offsets = [0, 64], sizes = [2, 32], strides = [1, 1]} : vector<2x128xf32> to vector<2x32xf32>
    %173 = vector.extract_strided_slice %168 {offsets = [0, 96], sizes = [2, 32], strides = [1, 1]} : vector<2x128xf32> to vector<2x32xf32>
    %174 = arith.mulf %171, %157 : vector<2x32xf32>
    %175 = arith.mulf %170, %172 : vector<2x32xf32>
    %176 = arith.addf %174, %175 : vector<2x32xf32>
    %177 = math.tanh %176 : vector<2x32xf32>
    %178 = arith.mulf %173, %177 : vector<2x32xf32>
    %c0_27 = arith.constant 0 : index
    %c0_28 = arith.constant 0 : index
    %179 = vector.load %arg3[%c0_27, %c0_28] : memref<33x20xf32, #tpu.memory_space<vmem>>, vector<32x20xf32>
    %c32_29 = arith.constant 32 : index
    %c0_30 = arith.constant 0 : index
    %180 = vector.load %arg3[%c32_29, %c0_30] : memref<33x20xf32, #tpu.memory_space<vmem>>, vector<1x20xf32>
    %181 = vector.shape_cast %45 : vector<2x32xf32> to vector<2x1x32xf32>
    %182 = vector.shape_cast %64 : vector<2x32xf32> to vector<2x1x32xf32>
    %183 = vector.shape_cast %83 : vector<2x32xf32> to vector<2x1x32xf32>
    %184 = vector.shape_cast %102 : vector<2x32xf32> to vector<2x1x32xf32>
    %185 = vector.shape_cast %121 : vector<2x32xf32> to vector<2x1x32xf32>
    %186 = vector.shape_cast %140 : vector<2x32xf32> to vector<2x1x32xf32>
    %187 = vector.shape_cast %159 : vector<2x32xf32> to vector<2x1x32xf32>
    %188 = vector.shape_cast %178 : vector<2x32xf32> to vector<2x1x32xf32>
    %189 = tpu.concatenate %181, %182, %183, %184, %185, %186, %187, %188 in 1 : vector<2x1x32xf32>, vector<2x1x32xf32>, vector<2x1x32xf32>, vector<2x1x32xf32>, vector<2x1x32xf32>, vector<2x1x32xf32>, vector<2x1x32xf32>, vector<2x1x32xf32> -> vector<2x8x32xf32>
    %190 = vector.shape_cast %189 : vector<2x8x32xf32> to vector<16x32xf32>
    %cst_31 = arith.constant dense<0.000000e+00> : vector<16x20xf32>
    %191 = tpu.matmul %190, %179, %cst_31 {dimension_numbers = #tpu.dot_dimension_numbers<[1], [0], [0], [1], [0, 0, 1, 1], [], []>} : vector<16x32xf32>, vector<32x20xf32>, vector<16x20xf32> -> vector<16x20xf32>
    %192 = vector.shape_cast %191 : vector<16x20xf32> to vector<2x8x20xf32>
    %193 = vector.shape_cast %180 : vector<1x20xf32> to vector<1x1x20xf32>
    %194 = vector.broadcast %193 : vector<1x1x20xf32> to vector<2x8x20xf32>
    %195 = arith.addf %192, %194 : vector<2x8x20xf32>
    %c0_32 = arith.constant 0 : index
    %c0_33 = arith.constant 0 : index
    %c0_34 = arith.constant 0 : index
    %196 = vector.load %arg4[%c0_32, %c0_33, %c0_34] : memref<2x8x20xf32, #tpu.memory_space<vmem>>, vector<2x8x20xf32>
    tpu.vector_store %arg4[%c0_32, %c0_33, %c0_34], %195 {strides = array<i32>} : memref<2x8x20xf32, #tpu.memory_space<vmem>>, vector<2x8x20xf32>,
    return
  }
}

</mosaic_0001>

<bundles_post_ra>
// kernel: decoder_forward.1
= control target key start
LH: loop header
LB: loop body
LE: loop exit
PB: predicated region body
PF: predicated region fallthrough
CT: control target
= control target key end

     0   :  { %v1825_v2 = vmov 0.0|0.0   ;;  %vm1826_vm0 = vmmov 0   ;;  %v1827_v4 = vmov 0.0   ;;  %vm31_vm1 = vcmask 130048   ;;  %s2094_s0 = inlined_call_operand.vmem [shape: f32[2,8,2], index: 0, kind: input, shape index: {}]   ;;  %s2095_s1 = inlined_call_operand.vmem [shape: f32[2,16], index: 1, kind: input, shape index: {}]   ;;  %s2096_s2 = inlined_call_operand.vmem [shape: f32[51,128], index: 2, kind: input, shape index: {}]   ;;  %s2097_s3 = inlined_call_operand.vmem [shape: f32[33,20], index: 3, kind: input, shape index: {}]   ;;  %s2098_s4 = inlined_call_operand.hbm [shape: f32[2,8,20], index: 4, kind: output, shape index: {}]  }
   0x1   :  { %v22_v0 = vld [vmem:[%s2096_s2 + $0x20] sm:$0xff]  ;;  %v23_v1 = vld [vmem:[%s2096_s2 + $0x28] sm:$0xff]  ;;  %1599 = vmatprep.subr.bf16.mxu0 %v1825_v2  ;;  %1497 = vmatprep.mubr.msk.f32.mxu0 %vm1826_vm0, %v1827_v4  ;;  %v20_v8 = vld [vmem:[%s2096_s2 + $0x10] sm:$0xff]  ;;  %v1828_v12 = vmov 0  }
   0x2   :  { %v1600_v3 = vpack.c.bf16 %v23_v1, %v22_v0  ;;  %v18_v5 = vld [vmem:[%s2096_s2] sm:$0xff]  ;;  %v19_v6 = vld [vmem:[%s2096_s2 + $0x8] sm:$0xff]  ;;  %1602 = vmatprep.subr.bf16.mxu1 %v1825_v2  ;;  %v21_v9 = vld [vmem:[%s2096_s2 + $0x18] sm:$0xff]  ;;  %1508 = vmatprep.mubr.msk.f32.mxu1 %vm1826_vm0, %v1827_v4 }
   0x3   :  { %v1877_v7 = vpack.c.bf16 %v19_v6, %v18_v5  ;;  %v106_v10 = vld [vmem:[%s2094_s0 + $0x8] sm:$0xff]  ;;  %v26_v11 = vld [vmem:[%s2095_s1] sm:$0x3]  ;;  %1669 = vset.pattern.permute.xlu0 %v1828_v12 }
   0x4   :  { %1601 = vmatpush3.bf16.msra.mxu0 %v1600_v3  ;;  %v105_v13 = vld [vmem:[%s2094_s0] sm:$0xff] }
   0x5   :  { %9 = vsyncpa [#allocation3], 0  ;;  %1604 = vmatpush3.bf16.msra.mxu1 %v1877_v7  ;;  %v1897_v14 = vpack.c.bf16 %v21_v9, %v20_v8  ;;  %114 = vperm.xlu0 %1669, %v106_v10   ;;  %v1829_v15 = vmov 1   ;;  %v117_v16 = vlaneseq  ;;  %v1830_v18 = vmov 1966171168   ;;  %s1832_s9 = smov 32  }
   0x6   :  { %1605 = vmatprep.subr.bf16.mxu1 %v1825_v2  ;;  %1671 = vset.pattern.permute.xlu1 %v1828_v12  ;;  %v141_v19 = vunpack.c.l.s4 %v1830_v18  ;;  %v24_v25 = vld [vmem:[%s2096_s2 + $0x30] sm:$0x3]  ;;  %v1416_v26 = vld [vmem:[%s2096_s2 + $0x32] ss:$0 sm:$0xff]  ;;  %s1831_s2 = smov 64   ;;  %vm305_vm2 = vcmask 1041409  }
   0x7   :  { %1498 = vmatmul.mubr.msk.f32.vlgmr.msra.gmra.mrb[0].mxu0 %vm31_vm1, %v26_v11  ;;  %109 = vperm.xlu1 %1671, %v105_v13   ;;  %v118_v17 = vshrl.u32 %v117_v16, 7  ;;  %vm174_vm3 = vcmask 261120   ;;  %vm1285_vm4 = vcmask 1040384   ;;  %vm1288_vm5 = vcmask 1041408   ;;  %s1833_s20 = smov [#allocation2]  }
   0x8   :  { %1608 = vmatprep.subr.bf16.mxu0 %v1825_v2  ;;  %1519 = vmatprep.mubr.msk.f32.mxu0 %vm1826_vm0, %v1827_v4  ;;  %v142_v22 = vunpack.c.0.s8 %v141_v19  ;;  %vm1291_vm6 = vcmask 1042432   ;;  %vm1294_vm7 = vcmask 1043456   ;;  %vm1297_vm8 = vcmask 1044480   ;;  %s1405_s21 = sshll.u32 %s1833_s20, 4  ;;  %s1406_s21 = int_to_ptr.vmem [resolvable:$true] %s1405_s21 }
   0x9   :  { %1607 = vmatpush3.bf16.msra.mxu1 %v1897_v14  ;;  %1670 = vset.pattern.permute.xlu0 %v1829_v15  ;;  %v119_v21 = vsub.s32 0, %v118_v17  ;;  %v133_v23 = vsub.s32 1, %v118_v17  ;;  %vm1300_vm9 = vcmask 1045504   ;;  %vm1303_vm10 = vcmask 1046528   ;;  %s1801_s22 = scalar_lea.vmem %s1406_s21, 256  ;;  %p1806_p1 = scmp.lt.s32.totalorder %s1406_s21, %s1406_s21 }
   0xa   :  { %128 = vperm.xlu0 %1670, %v106_v10   ;;  %1610 = vmatpush3.bf16.msra.mxu0 %v1877_v7  ;;  %v145_v29 = vsub.s32 %v142_v22, %v118_v17  ;;  %vm1397_vm11 = vcmask 162816   ;;  %p1802_p0 = scmp.ne.s32.totalorder %s1406_s21, %s1801_s22  ;;  %p1807_p2 = scmp.lt.s32.totalorder %s1801_s22, %s1801_s22 }
   0xb   :  { %1672 = vset.pattern.permute.xlu1 %v1829_v15  ;;  %1611 = vmatprep.subr.bf16.mxu0 %v1825_v2  ;;  %v120_v28 = vrot.slane %v24_v25, %v119_v21  ;;  %v134_v30 = vrot.slane %v24_v25, %v133_v23 }
   0xc   :  { %1509 = vmatmul.mubr.f32.vlgmr.msra.gmra.mrb[0].mxu1 %v1827_v4  ;;  %124 = vperm.xlu1 %1672, %v105_v13   ;;  %p1808_p3 = por %p1807_p2, %p1806_p1 }
   0xd   :  { %1614 = vmatprep.subr.bf16.mxu1 %v1825_v2  ;;  %1530 = vmatprep.mubr.msk.f32.mxu1 %vm1826_vm0, %v1827_v4 }
   0xe   :  { %1613 = vmatpush3.bf16.msra.mxu0 %v1897_v14  ;;  %1616 = vmatpush3.bf16.msra.mxu1 %v1877_v7  ;;  %p1809_p4 = pnand %p1808_p3, %p1802_p0 }
   0xf   :  { %1617 = vmatprep.subr.bf16.mxu1 %v1825_v2  ;;  %1620 = vmatprep.subr.bf16.mxu0 %v1825_v2 }
  0x12   :  { %1619 = vmatpush3.bf16.msra.mxu1 %v1897_v14 }
  0x13   :  { %1626 = vmatprep.subr.bf16.mxu1 %v1825_v2 }
  0x84   :  { %v115_v24 = vpop.permute.xlu0 %114 }
  0x85   :  { %v122_v38 = vmul.f32 %v120_v28, %v115_v24 }
  0x86   :  { %v110_v20 = vpop.permute.xlu1 %109 }
  0x87   :  { %v121_v32 = vmul.f32 %v120_v28, %v110_v20 }
  0x89   :  { %v129_v36 = vpop.permute.xlu0 %128 }
  0x8a   :  { %v136_v41 = vmul.f32 %v134_v30, %v129_v36 }
  0x8b   :  { %v125_v27 = vpop.permute.xlu1 %124 }
  0x8c   :  { %v135_v35 = vmul.f32 %v134_v30, %v125_v27  ;;  %v138_v47 = vadd.f32 %v136_v41, %v122_v38 }
  0x8e   :  { %v137_v42 = vadd.f32 %v135_v35, %v121_v32 }
  0xda   :  { %v101_v31 = vpop.f32.mrb[0].mxu0 }
  0xdb   :  { %v102_v33 = vadd.f32 %v1416_v26, %v101_v31  ;;  %v1499_v34 = vpop.f32.mrb[1].mxu0 }
  0xdd   :  { %v146_v37 = vrot.slane %v102_v33, %v145_v29 }
  0xdf   :  { %v147_v39 = vcombine.high %v146_v37, %v146_v37  ;;  %v154_v40 = vrot.slane %v146_v37, %v145_v29  ;;  %v244_v43 = vpop.f32.mrb[0].mxu1 }
  0xe0   :  { %v1510_v44 = vpop.f32.mrb[1].mxu1  ;;  %v249_v50 = vrot.slane %v244_v43, 1 }
  0xe1   :  { %v161_v45 = vrot.slane %v147_v39, %v145_v29  ;;  %v165_v46 = vrot.slane %v154_v40, %v119_v21 }
  0xe3   :  { %v169_v48 = vrot.slane %v161_v45, %v119_v21  ;;  %v1922_v49 = vadd.f32 %v165_v46, %v137_v42 }
  0xe5   :  { %v1924_v51 = vadd.f32 %v169_v48, %v138_v47  ;;  %v252_v52 = vadd.f32 %v244_v43, %v1922_v49 }
  0xe7   :  { %v253_v53 = vadd.f32 %v249_v50, %v1924_v51  ;;  %1673 = vtanh.f32 %v252_v52  ;;  %v1418_v56 = vmul.f32 -1.442695, %v252_v52 }
  0xe9   :  { %1675 = vtanh.f32 %v253_v53  ;;  %v1419_v57 = vmul.f32 -1.442695, %v253_v53 }
  0xea   :  { %1677 = vpow2.f32 %v1418_v56 }
  0xeb   :  { %1679 = vpow2.f32 %v1419_v57 }
  0xf1   :  { %v1674_v54 = vpop.eup %1673 }
  0xf2   :  { %272 = vrot.lane.b32.xlu0 %v1674_v54, %s1831_s2 }
  0xf3   :  { %v1676_v55 = vpop.eup %1675 }
  0xf4   :  { %274 = vrot.lane.b32.xlu1 %v1676_v55, %s1831_s2  ;;  %v1678_v58 = vpop.eup %1677 }
  0xf5   :  { %v1680_v59 = vpop.eup %1679  ;;  %v260_v60 = vadd.f32 1.0, %v1678_v58 }
  0xf6   :  { %v261_v61 = vadd.f32 1.0, %v1680_v59 }
  0xf7   :  { %1681 = vrcp.f32 %v260_v60 }
  0xf8   :  { %1683 = vrcp.f32 %v261_v61 }
 0x101   :  { %v1682_v62 = vpop.eup %1681 }
 0x102   :  { %v1684_v1 = vpop.eup %1683  ;;  %v268_v6 = vmul.f32 0.0, %v1682_v62 }
 0x103   :  { %v269_v10 = vmul.f32 0.0, %v1684_v1 }
 0x164   :  { %v273_v63 = vpop.permute.xlu0 %272 }
 0x165   :  { %v278_v0 = vmul.f32 %v1682_v62, %v273_v63 }
 0x166   :  { %v275_v3 = vpop.permute.xlu1 %274 }
 0x167   :  { %282 = vrot.lane.b32.xlu0 %v278_v0, %s1832_s9  ;;  %v279_v5 = vmul.f32 %v1684_v1, %v275_v3 }
 0x169   :  { %284 = vrot.lane.b32.xlu1 %v279_v5, %s1832_s9 }
 0x1d9   :  { %v283_v8 = vpop.permute.xlu0 %282 }
 0x1da   :  { %v288_v9 = vadd.f32 %v283_v8, %v268_v6 }
 0x1db   :  { %v285_v11 = vpop.permute.xlu1 %284 }
 0x1dc   :  { %1685 = vtanh.f32 %v288_v9  ;;  %v289_v12 = vadd.f32 %v285_v11, %v269_v10  ;;  %v403_v44 = vrot.slane %v288_v9, 7 }
 0x1de   :  { %1687 = vtanh.f32 %v289_v12  ;;  %v404_v42 = vrot.slane %v289_v12, 7 }
 0x1e6   :  { %v1686_v13 = vpop.eup %1685 }
 0x1e7   :  { %294 = vrot.lane.b32.xlu0 %v1686_v13, %s1831_s2 }
 0x1e8   :  { %v1688_v15 = vpop.eup %1687 }
 0x1e9   :  { %296 = vrot.lane.b32.xlu1 %v1688_v15, %s1831_s2 }
 0x259   :  { %v295_v16 = vpop.permute.xlu0 %294 }
 0x25a   :  { %v1936_v19 = vmul.f32 %v1682_v62, %v295_v16 }
 0x25b   :  { %v297_v17 = vpop.permute.xlu1 %296 }
 0x25c   :  { %v1934_v18 = vmul.f32 %v1684_v1, %v297_v17 }
 0x25e   :  { %v304_v20 = vrot.slane %v1934_v18, 7 }
 0x260   :  { %v306_v21 = vsel %vm305_vm2, %v304_v20, %v1936_v19 }
 0x261   :  { %307 = vrot.lane.b32.xlu1 %v306_v21, %s1832_s9 }
 0x2d3   :  { %v308_v22 = vpop.permute.xlu1 %307 }
 0x2d4   :  { %1520 = vmatmul.mubr.msk.f32.vlgmr.msra.gmra.mrb[2].mxu0 %vm174_vm3, %v308_v22 }
 0x2d5   :  { %1622 = vmatpush3.bf16.msra.mxu0 %v1877_v7  ;;  %1541 = vmatprep.mubr.msk.f32.mxu0 %vm1826_vm0, %v1827_v4 }
 0x2d6   :  { %1623 = vmatprep.subr.bf16.mxu0 %v1825_v2 }
 0x2d9   :  { %1625 = vmatpush3.bf16.msra.mxu0 %v1897_v14 }
 0x2da   :  { %1632 = vmatprep.subr.bf16.mxu0 %v1825_v2 }
 0x3a7   :  { %v377_v23 = vpop.f32.mrb[2].mxu0 }
 0x3a8   :  { %v382_v24 = vrot.slane %v377_v23, 7  ;;  %v386_v25 = vadd.f32 %v377_v23, %v1924_v51  ;;  %v1521_v26 = vpop.f32.mrb[3].mxu0 }
 0x3aa   :  { %v385_v27 = vadd.f32 %v382_v24, %v1922_v49  ;;  %1689 = vtanh.f32 %v386_v25  ;;  %v1422_v30 = vmul.f32 -1.442695, %v386_v25 }
 0x3ac   :  { %1691 = vtanh.f32 %v385_v27  ;;  %v1421_v31 = vmul.f32 -1.442695, %v385_v27 }
 0x3ad   :  { %1693 = vpow2.f32 %v1422_v30 }
 0x3ae   :  { %1695 = vpow2.f32 %v1421_v31 }
 0x3b4   :  { %v1690_v28 = vpop.eup %1689 }
 0x3b5   :  { %413 = vrot.lane.b32.xlu1 %v1690_v28, %s1831_s2 }
 0x3b6   :  { %v1692_v29 = vpop.eup %1691 }
 0x3b7   :  { %411 = vrot.lane.b32.xlu0 %v1692_v29, %s1831_s2  ;;  %v1694_v32 = vpop.eup %1693 }
 0x3b8   :  { %v1696_v33 = vpop.eup %1695  ;;  %v394_v34 = vadd.f32 1.0, %v1694_v32 }
 0x3b9   :  { %v393_v35 = vadd.f32 1.0, %v1696_v33 }
 0x3ba   :  { %1697 = vrcp.f32 %v394_v34 }
 0x3bb   :  { %1699 = vrcp.f32 %v393_v35 }
 0x3c4   :  { %v1698_v36 = vpop.eup %1697 }
 0x3c5   :  { %v1700_v39 = vpop.eup %1699  ;;  %v408_v43 = vmul.f32 %v1698_v36, %v404_v42 }
 0x3c6   :  { %v407_v47 = vmul.f32 %v1700_v39, %v403_v44 }
 0x427   :  { %v414_v37 = vpop.permute.xlu1 %413 }
 0x428   :  { %v418_v38 = vmul.f32 %v1698_v36, %v414_v37 }
 0x429   :  { %v412_v40 = vpop.permute.xlu0 %411 }
 0x42a   :  { %423 = vrot.lane.b32.xlu1 %v418_v38, %s1832_s9  ;;  %v417_v41 = vmul.f32 %v1700_v39, %v412_v40 }
 0x42c   :  { %421 = vrot.lane.b32.xlu0 %v417_v41, %s1832_s9 }
 0x49c   :  { %v424_v45 = vpop.permute.xlu1 %423 }
 0x49d   :  { %v428_v46 = vadd.f32 %v424_v45, %v408_v43 }
 0x49e   :  { %v422_v48 = vpop.permute.xlu0 %421 }
 0x49f   :  { %1701 = vtanh.f32 %v428_v46  ;;  %v427_v50 = vadd.f32 %v422_v48, %v407_v47  ;;  %v543_v24 = vrot.slane %v428_v46, 7 }
 0x4a1   :  { %1703 = vtanh.f32 %v427_v50  ;;  %v542_v23 = vrot.slane %v427_v50, 7 }
 0x4a9   :  { %v1702_v52 = vpop.eup %1701 }
 0x4aa   :  { %435 = vrot.lane.b32.xlu1 %v1702_v52, %s1831_s2 }
 0x4ab   :  { %v1704_v53 = vpop.eup %1703 }
 0x4ac   :  { %433 = vrot.lane.b32.xlu0 %v1704_v53, %s1831_s2 }
 0x51c   :  { %v436_v54 = vpop.permute.xlu1 %435 }
 0x51d   :  { %v1957_v57 = vmul.f32 %v1698_v36, %v436_v54 }
 0x51e   :  { %v434_v55 = vpop.permute.xlu0 %433 }
 0x51f   :  { %v439_v56 = vmul.f32 %v1700_v39, %v434_v55  ;;  %v1287_v38 = vsel %vm1285_vm4, %v1934_v18, %v1957_v57 }
 0x521   :  { %v443_v58 = vrot.slane %v439_v56, 1  ;;  %v1286_v36 = vsel %vm1285_vm4, %v1936_v19, %v439_v56 }
 0x523   :  { %v444_v59 = vsel %vm305_vm2, %v1957_v57, %v443_v58 }
 0x524   :  { %445 = vrot.lane.b32.xlu0 %v444_v59, %s1832_s9 }
 0x596   :  { %v446_v60 = vpop.permute.xlu0 %445 }
 0x597   :  { %1531 = vmatmul.mubr.msk.f32.vlgmr.msra.gmra.mrb[2].mxu1 %vm174_vm3, %v446_v60 }
 0x598   :  { %1628 = vmatpush3.bf16.msra.mxu1 %v1877_v7  ;;  %1552 = vmatprep.mubr.msk.f32.mxu1 %vm1826_vm0, %v1827_v4 }
 0x599   :  { %1629 = vmatprep.subr.bf16.mxu1 %v1825_v2 }
 0x59c   :  { %1631 = vmatpush3.bf16.msra.mxu1 %v1897_v14 }
 0x59d   :  { %1638 = vmatprep.subr.bf16.mxu1 %v1825_v2 }
 0x66a   :  { %v515_v61 = vpop.f32.mrb[2].mxu1 }
 0x66b   :  { %v520_v62 = vrot.slane %v515_v61, 6  ;;  %v521_v63 = vrot.slane %v515_v61, 7  ;;  %v1532_v0 = vpop.f32.mrb[3].mxu1 }
 0x66d   :  { %v524_v1 = vadd.f32 %v520_v62, %v1922_v49  ;;  %v525_v3 = vadd.f32 %v521_v63, %v1924_v51 }
 0x66f   :  { %1705 = vtanh.f32 %v524_v1  ;;  %v1424_v8 = vmul.f32 -1.442695, %v524_v1  ;;  %v1425_v9 = vmul.f32 -1.442695, %v525_v3 }
 0x670   :  { %1707 = vtanh.f32 %v525_v3 }
 0x671   :  { %1709 = vpow2.f32 %v1424_v8 }
 0x672   :  { %1711 = vpow2.f32 %v1425_v9 }
 0x679   :  { %v1706_v5 = vpop.eup %1705 }
 0x67a   :  { %v1708_v6 = vpop.eup %1707  ;;  %550 = vrot.lane.b32.xlu1 %v1706_v5, %s1831_s2 }
 0x67b   :  { %552 = vrot.lane.b32.xlu0 %v1708_v6, %s1831_s2  ;;  %v1710_v10 = vpop.eup %1709 }
 0x67c   :  { %v1712_v11 = vpop.eup %1711  ;;  %v532_v12 = vadd.f32 1.0, %v1710_v10 }
 0x67d   :  { %v533_v13 = vadd.f32 1.0, %v1712_v11 }
 0x67e   :  { %1713 = vrcp.f32 %v532_v12 }
 0x67f   :  { %1715 = vrcp.f32 %v533_v13 }
 0x688   :  { %v1714_v15 = vpop.eup %1713 }
 0x689   :  { %v1716_v17 = vpop.eup %1715  ;;  %v546_v25 = vmul.f32 %v1714_v15, %v542_v23 }
 0x68a   :  { %v547_v26 = vmul.f32 %v1716_v17, %v543_v24 }
 0x6ec   :  { %v551_v16 = vpop.permute.xlu1 %550 }
 0x6ed   :  { %v553_v20 = vpop.permute.xlu0 %552  ;;  %v556_v21 = vmul.f32 %v1714_v15, %v551_v16 }
 0x6ee   :  { %v557_v22 = vmul.f32 %v1716_v17, %v553_v20 }
 0x6ef   :  { %560 = vrot.lane.b32.xlu1 %v556_v21, %s1832_s9 }
 0x6f0   :  { %562 = vrot.lane.b32.xlu0 %v557_v22, %s1832_s9 }
 0x761   :  { %v561_v27 = vpop.permute.xlu1 %560 }
 0x762   :  { %v563_v28 = vpop.permute.xlu0 %562  ;;  %v566_v29 = vadd.f32 %v561_v27, %v546_v25 }
 0x763   :  { %v567_v30 = vadd.f32 %v563_v28, %v547_v26 }
 0x764   :  { %1717 = vtanh.f32 %v566_v29  ;;  %v682_v1 = vrot.slane %v566_v29, 7 }
 0x765   :  { %1719 = vtanh.f32 %v567_v30  ;;  %v683_v3 = vrot.slane %v567_v30, 7 }
 0x76e   :  { %v1718_v31 = vpop.eup %1717 }
 0x76f   :  { %v1720_v32 = vpop.eup %1719  ;;  %572 = vrot.lane.b32.xlu1 %v1718_v31, %s1831_s2 }
 0x770   :  { %574 = vrot.lane.b32.xlu0 %v1720_v32, %s1831_s2 }
 0x7e1   :  { %v573_v33 = vpop.permute.xlu1 %572 }
 0x7e2   :  { %v575_v34 = vpop.permute.xlu0 %574  ;;  %v578_v35 = vmul.f32 %v1714_v15, %v573_v33 }
 0x7e3   :  { %v579_v37 = vmul.f32 %v1716_v17, %v575_v34 }
 0x7e4   :  { %v582_v39 = vrot.slane %v578_v35, 2  ;;  %v1980_v40 = vsel %vm1288_vm5, %v1286_v36, %v578_v35 }
 0x7e5   :  { %v583_v41 = vrot.slane %v579_v37, 1  ;;  %v1982_v42 = vsel %vm1288_vm5, %v1287_v38, %v579_v37 }
 0x7e7   :  { %v584_v43 = vsel %vm305_vm2, %v583_v41, %v582_v39 }
 0x7e8   :  { %585 = vrot.lane.b32.xlu1 %v584_v43, %s1832_s9 }
 0x85a   :  { %v586_v44 = vpop.permute.xlu1 %585 }
 0x85b   :  { %1542 = vmatmul.mubr.msk.f32.vlgmr.msra.gmra.mrb[4].mxu0 %vm174_vm3, %v586_v44 }
 0x85c   :  { %1634 = vmatpush3.bf16.msra.mxu0 %v1877_v7  ;;  %1563 = vmatprep.mubr.msk.f32.mxu0 %vm1826_vm0, %v1827_v4 }
 0x85d   :  { %1635 = vmatprep.subr.bf16.mxu0 %v1825_v2 }
 0x860   :  { %1637 = vmatpush3.bf16.msra.mxu0 %v1897_v14 }
 0x861   :  { %1644 = vmatprep.subr.bf16.mxu0 %v1825_v2 }
 0x92e   :  { %v655_v18 = vpop.f32.mrb[4].mxu0 }
 0x92f   :  { %v660_v19 = vrot.slane %v655_v18, 5  ;;  %v661_v45 = vrot.slane %v655_v18, 6  ;;  %v1543_v46 = vpop.f32.mrb[5].mxu0 }
 0x931   :  { %v664_v47 = vadd.f32 %v660_v19, %v1922_v49  ;;  %v665_v48 = vadd.f32 %v661_v45, %v1924_v51 }
 0x933   :  { %1721 = vtanh.f32 %v664_v47  ;;  %v1427_v53 = vmul.f32 -1.442695, %v664_v47  ;;  %v1428_v54 = vmul.f32 -1.442695, %v665_v48 }
 0x934   :  { %1723 = vtanh.f32 %v665_v48 }
 0x935   :  { %1725 = vpow2.f32 %v1427_v53 }
 0x936   :  { %1727 = vpow2.f32 %v1428_v54 }
 0x93d   :  { %v1722_v50 = vpop.eup %1721 }
 0x93e   :  { %v1724_v52 = vpop.eup %1723  ;;  %690 = vrot.lane.b32.xlu0 %v1722_v50, %s1831_s2 }
 0x93f   :  { %692 = vrot.lane.b32.xlu1 %v1724_v52, %s1831_s2  ;;  %v1726_v55 = vpop.eup %1725 }
 0x940   :  { %v1728_v56 = vpop.eup %1727  ;;  %v672_v57 = vadd.f32 1.0, %v1726_v55 }
 0x941   :  { %v673_v58 = vadd.f32 1.0, %v1728_v56 }
 0x942   :  { %1729 = vrcp.f32 %v672_v57 }
 0x943   :  { %1731 = vrcp.f32 %v673_v58 }
 0x94c   :  { %v1730_v59 = vpop.eup %1729 }
 0x94d   :  { %v1732_v61 = vpop.eup %1731  ;;  %v686_v5 = vmul.f32 %v1730_v59, %v682_v1 }
 0x94e   :  { %v687_v6 = vmul.f32 %v1732_v61, %v683_v3 }
 0x9b0   :  { %v691_v60 = vpop.permute.xlu0 %690 }
 0x9b1   :  { %v693_v62 = vpop.permute.xlu1 %692  ;;  %v696_v63 = vmul.f32 %v1730_v59, %v691_v60 }
 0x9b2   :  { %v697_v0 = vmul.f32 %v1732_v61, %v693_v62 }
 0x9b3   :  { %700 = vrot.lane.b32.xlu0 %v696_v63, %s1832_s9 }
 0x9b4   :  { %702 = vrot.lane.b32.xlu1 %v697_v0, %s1832_s9 }
 0xa25   :  { %v701_v8 = vpop.permute.xlu0 %700 }
 0xa26   :  { %v703_v9 = vpop.permute.xlu1 %702  ;;  %v706_v10 = vadd.f32 %v701_v8, %v686_v5 }
 0xa27   :  { %v707_v11 = vadd.f32 %v703_v9, %v687_v6 }
 0xa28   :  { %1733 = vtanh.f32 %v706_v10  ;;  %v822_v45 = vrot.slane %v706_v10, 7 }
 0xa29   :  { %1735 = vtanh.f32 %v707_v11  ;;  %v823_v46 = vrot.slane %v707_v11, 7 }
 0xa32   :  { %v1734_v12 = vpop.eup %1733 }
 0xa33   :  { %v1736_v13 = vpop.eup %1735  ;;  %712 = vrot.lane.b32.xlu0 %v1734_v12, %s1831_s2 }
 0xa34   :  { %714 = vrot.lane.b32.xlu1 %v1736_v13, %s1831_s2 }
 0xaa5   :  { %v713_v15 = vpop.permute.xlu0 %712 }
 0xaa6   :  { %v715_v16 = vpop.permute.xlu1 %714  ;;  %v718_v17 = vmul.f32 %v1730_v59, %v713_v15 }
 0xaa7   :  { %v719_v20 = vmul.f32 %v1732_v61, %v715_v16 }
 0xaa8   :  { %v722_v21 = vrot.slane %v718_v17, 3  ;;  %v1292_v22 = vsel %vm1291_vm6, %v1980_v40, %v718_v17 }
 0xaa9   :  { %v723_v23 = vrot.slane %v719_v20, 2  ;;  %v1293_v24 = vsel %vm1291_vm6, %v1982_v42, %v719_v20 }
 0xaab   :  { %v724_v25 = vsel %vm305_vm2, %v723_v23, %v722_v21 }
 0xaac   :  { %725 = vrot.lane.b32.xlu0 %v724_v25, %s1832_s9 }
 0xb1e   :  { %v726_v26 = vpop.permute.xlu0 %725 }
 0xb1f   :  { %1553 = vmatmul.mubr.msk.f32.vlgmr.msra.gmra.mrb[4].mxu1 %vm174_vm3, %v726_v26 }
 0xb20   :  { %1640 = vmatpush3.bf16.msra.mxu1 %v1877_v7  ;;  %1574 = vmatprep.mubr.msk.f32.mxu1 %vm1826_vm0, %v1827_v4 }
 0xb21   :  { %1641 = vmatprep.subr.bf16.mxu1 %v1825_v2 }
 0xb24   :  { %1643 = vmatpush3.bf16.msra.mxu1 %v1897_v14 }
 0xbf2   :  { %v795_v27 = vpop.f32.mrb[4].mxu1 }
 0xbf3   :  { %v800_v28 = vrot.slane %v795_v27, 4  ;;  %v801_v29 = vrot.slane %v795_v27, 5  ;;  %v1554_v30 = vpop.f32.mrb[5].mxu1 }
 0xbf5   :  { %v804_v31 = vadd.f32 %v800_v28, %v1922_v49  ;;  %v805_v32 = vadd.f32 %v801_v29, %v1924_v51 }
 0xbf7   :  { %1737 = vtanh.f32 %v804_v31  ;;  %v1430_v35 = vmul.f32 -1.442695, %v804_v31  ;;  %v1431_v36 = vmul.f32 -1.442695, %v805_v32 }
 0xbf8   :  { %1739 = vtanh.f32 %v805_v32 }
 0xbf9   :  { %1741 = vpow2.f32 %v1430_v35 }
 0xbfa   :  { %1743 = vpow2.f32 %v1431_v36 }
 0xc01   :  { %v1738_v33 = vpop.eup %1737 }
 0xc02   :  { %v1740_v34 = vpop.eup %1739  ;;  %830 = vrot.lane.b32.xlu1 %v1738_v33, %s1831_s2 }
 0xc03   :  { %832 = vrot.lane.b32.xlu0 %v1740_v34, %s1831_s2  ;;  %v1742_v37 = vpop.eup %1741 }
 0xc04   :  { %v1744_v38 = vpop.eup %1743  ;;  %v812_v39 = vadd.f32 1.0, %v1742_v37 }
 0xc05   :  { %v813_v40 = vadd.f32 1.0, %v1744_v38 }
 0xc06   :  { %1745 = vrcp.f32 %v812_v39 }
 0xc07   :  { %1747 = vrcp.f32 %v813_v40 }
 0xc10   :  { %v1746_v41 = vpop.eup %1745 }
 0xc11   :  { %v1748_v43 = vpop.eup %1747  ;;  %v826_v47 = vmul.f32 %v1746_v41, %v822_v45 }
 0xc12   :  { %v827_v48 = vmul.f32 %v1748_v43, %v823_v46 }
 0xc74   :  { %v831_v42 = vpop.permute.xlu1 %830 }
 0xc75   :  { %v833_v44 = vpop.permute.xlu0 %832  ;;  %v836_v18 = vmul.f32 %v1746_v41, %v831_v42 }
 0xc76   :  { %v837_v19 = vmul.f32 %v1748_v43, %v833_v44 }
 0xc77   :  { %840 = vrot.lane.b32.xlu1 %v836_v18, %s1832_s9 }
 0xc78   :  { %842 = vrot.lane.b32.xlu0 %v837_v19, %s1832_s9 }
 0xce9   :  { %v841_v50 = vpop.permute.xlu1 %840 }
 0xcea   :  { %v843_v52 = vpop.permute.xlu0 %842  ;;  %v846_v53 = vadd.f32 %v841_v50, %v826_v47 }
 0xceb   :  { %v847_v54 = vadd.f32 %v843_v52, %v827_v48 }
 0xcec   :  { %1749 = vtanh.f32 %v846_v53  ;;  %v962_v25 = vrot.slane %v846_v53, 7 }
 0xced   :  { %1751 = vtanh.f32 %v847_v54  ;;  %v963_v26 = vrot.slane %v847_v54, 7 }
 0xcf6   :  { %v1750_v55 = vpop.eup %1749 }
 0xcf7   :  { %v1752_v56 = vpop.eup %1751  ;;  %852 = vrot.lane.b32.xlu1 %v1750_v55, %s1831_s2 }
 0xcf8   :  { %854 = vrot.lane.b32.xlu0 %v1752_v56, %s1831_s2 }
 0xd69   :  { %v853_v57 = vpop.permute.xlu1 %852 }
 0xd6a   :  { %v855_v58 = vpop.permute.xlu0 %854  ;;  %v858_v59 = vmul.f32 %v1746_v41, %v853_v57 }
 0xd6b   :  { %v859_v60 = vmul.f32 %v1748_v43, %v855_v58 }
 0xd6c   :  { %v862_v61 = vrot.slane %v858_v59, 4  ;;  %v1295_v62 = vsel %vm1294_vm7, %v1292_v22, %v858_v59 }
 0xd6d   :  { %v863_v63 = vrot.slane %v859_v60, 3  ;;  %v1296_v0 = vsel %vm1294_vm7, %v1293_v24, %v859_v60 }
 0xd6f   :  { %v864_v1 = vsel %vm305_vm2, %v863_v63, %v862_v61 }
 0xd70   :  { %865 = vrot.lane.b32.xlu1 %v864_v1, %s1832_s9 }
 0xde2   :  { %v866_v3 = vpop.permute.xlu1 %865 }
 0xde3   :  { %1564 = vmatmul.mubr.msk.f32.vlgmr.msra.gmra.mrb[6].mxu0 %vm174_vm3, %v866_v3 }
 0xde4   :  { %1646 = vmatpush3.bf16.msra.mxu0 %v1877_v7  ;;  %1585 = vmatprep.mubr.msk.f32.mxu0 %vm1826_vm0, %v1827_v4 }
 0xde5   :  { %1647 = vmatprep.subr.bf16.mxu0 %v1825_v2 }
 0xde8   :  { %1649 = vmatpush3.bf16.msra.mxu0 %v1897_v14 }
 0xeb6   :  { %v935_v5 = vpop.f32.mrb[6].mxu0 }
 0xeb7   :  { %v940_v6 = vrot.slane %v935_v5, 3  ;;  %v941_v8 = vrot.slane %v935_v5, 4  ;;  %v1565_v9 = vpop.f32.mrb[7].mxu0 }
 0xeb9   :  { %v944_v10 = vadd.f32 %v940_v6, %v1922_v49  ;;  %v945_v11 = vadd.f32 %v941_v8, %v1924_v51 }
 0xebb   :  { %1753 = vtanh.f32 %v944_v10  ;;  %v1433_v4 = vmul.f32 -1.442695, %v944_v10  ;;  %v1434_v2 = vmul.f32 -1.442695, %v945_v11 }
 0xebc   :  { %1755 = vtanh.f32 %v945_v11 }
 0xebd   :  { %1757 = vpow2.f32 %v1433_v4 }
 0xebe   :  { %1759 = vpow2.f32 %v1434_v2 }
 0xec5   :  { %v1754_v12 = vpop.eup %1753 }
 0xec6   :  { %v1756_v13 = vpop.eup %1755  ;;  %970 = vrot.lane.b32.xlu0 %v1754_v12, %s1831_s2 }
 0xec7   :  { %972 = vrot.lane.b32.xlu1 %v1756_v13, %s1831_s2  ;;  %v1758_v7 = vpop.eup %1757 }
 0xec8   :  { %v1760_v14 = vpop.eup %1759  ;;  %v952_v15 = vadd.f32 1.0, %v1758_v7 }
 0xec9   :  { %v953_v16 = vadd.f32 1.0, %v1760_v14 }
 0xeca   :  { %1761 = vrcp.f32 %v952_v15 }
 0xecb   :  { %1763 = vrcp.f32 %v953_v16 }
 0xed4   :  { %v1762_v17 = vpop.eup %1761 }
 0xed5   :  { %v1764_v21 = vpop.eup %1763  ;;  %v966_v27 = vmul.f32 %v1762_v17, %v962_v25 }
 0xed6   :  { %v967_v28 = vmul.f32 %v1764_v21, %v963_v26 }
 0xf38   :  { %v971_v20 = vpop.permute.xlu0 %970 }
 0xf39   :  { %v973_v22 = vpop.permute.xlu1 %972  ;;  %v976_v23 = vmul.f32 %v1762_v17, %v971_v20 }
 0xf3a   :  { %v977_v24 = vmul.f32 %v1764_v21, %v973_v22 }
 0xf3b   :  { %980 = vrot.lane.b32.xlu0 %v976_v23, %s1832_s9 }
 0xf3c   :  { %982 = vrot.lane.b32.xlu1 %v977_v24, %s1832_s9 }
 0xfad   :  { %v981_v29 = vpop.permute.xlu0 %980 }
 0xfae   :  { %v983_v30 = vpop.permute.xlu1 %982  ;;  %v986_v31 = vadd.f32 %v981_v29, %v966_v27 }
 0xfaf   :  { %v987_v32 = vadd.f32 %v983_v30, %v967_v28 }
 0xfb0   :  { %1765 = vtanh.f32 %v986_v31  ;;  %v1102_v1 = vrot.slane %v986_v31, 7 }
 0xfb1   :  { %1767 = vtanh.f32 %v987_v32  ;;  %v1103_v3 = vrot.slane %v987_v32, 7 }
 0xfba   :  { %v1766_v33 = vpop.eup %1765 }
 0xfbb   :  { %v1768_v34 = vpop.eup %1767  ;;  %992 = vrot.lane.b32.xlu0 %v1766_v33, %s1831_s2 }
 0xfbc   :  { %994 = vrot.lane.b32.xlu1 %v1768_v34, %s1831_s2 }
0x102d   :  { %v993_v35 = vpop.permute.xlu0 %992 }
0x102e   :  { %v995_v36 = vpop.permute.xlu1 %994  ;;  %v998_v37 = vmul.f32 %v1762_v17, %v993_v35 }
0x102f   :  { %v999_v38 = vmul.f32 %v1764_v21, %v995_v36 }
0x1030   :  { %v1002_v39 = vrot.slane %v998_v37, 5  ;;  %v1298_v40 = vsel %vm1297_vm8, %v1295_v62, %v998_v37 }
0x1031   :  { %v1003_v41 = vrot.slane %v999_v38, 4  ;;  %v1299_v42 = vsel %vm1297_vm8, %v1296_v0, %v999_v38 }
0x1033   :  { %v1004_v43 = vsel %vm305_vm2, %v1003_v41, %v1002_v39 }
0x1034   :  { %1005 = vrot.lane.b32.xlu0 %v1004_v43, %s1832_s9 }
0x10a6   :  { %v1006_v44 = vpop.permute.xlu0 %1005 }
0x10a7   :  { %1575 = vmatmul.mubr.msk.f32.vlgmr.msra.gmra.mrb[6].mxu1 %vm174_vm3, %v1006_v44 }
0x117a   :  { %v1075_v18 = vpop.f32.mrb[6].mxu1 }
0x117b   :  { %v1080_v19 = vrot.slane %v1075_v18, 2  ;;  %v1081_v45 = vrot.slane %v1075_v18, 3  ;;  %v1576_v46 = vpop.f32.mrb[7].mxu1 }
0x117d   :  { %v1084_v47 = vadd.f32 %v1080_v19, %v1922_v49  ;;  %v1085_v48 = vadd.f32 %v1081_v45, %v1924_v51 }
0x117f   :  { %1769 = vtanh.f32 %v1084_v47  ;;  %v1436_v53 = vmul.f32 -1.442695, %v1084_v47  ;;  %v1437_v54 = vmul.f32 -1.442695, %v1085_v48  ;;  %v1280_v47 = vld [vmem:[%s2097_s3] sm:$0xff] }
0x1180   :  { %1771 = vtanh.f32 %v1085_v48  ;;  %v1281_v48 = vld [vmem:[%s2097_s3 + $0x8] sm:$0xff] }
0x1181   :  { %1773 = vpow2.f32 %v1436_v53  ;;  %v1283_v53 = vld [vmem:[%s2097_s3 + $0x18] sm:$0xff] }
0x1182   :  { %1775 = vpow2.f32 %v1437_v54 }
0x1189   :  { %v1770_v50 = vpop.eup %1769 }
0x118a   :  { %v1772_v52 = vpop.eup %1771  ;;  %1110 = vrot.lane.b32.xlu1 %v1770_v50, %s1831_s2  ;;  %v1282_v50 = vld [vmem:[%s2097_s3 + $0x10] sm:$0xff] }
0x118b   :  { %1112 = vrot.lane.b32.xlu0 %v1772_v52, %s1831_s2  ;;  %v1774_v55 = vpop.eup %1773  ;;  %v1650_v52 = vpack.c.bf16 %v1281_v48, %v1280_v47  ;;  %v1654_v54 = vpack.c.bf16 %v1283_v53, %v1282_v50 }
0x118c   :  { %v1776_v56 = vpop.eup %1775  ;;  %v1092_v57 = vadd.f32 1.0, %v1774_v55 }
0x118d   :  { %v1093_v58 = vadd.f32 1.0, %v1776_v56  ;;  %1651 = vmatprep.subr.bf16.mxu1 %v1650_v52 }
0x118e   :  { %1777 = vrcp.f32 %v1092_v57  ;;  %1653 = vmatpush3.bf16.msra.mxu1 %v1650_v52 }
0x118f   :  { %1779 = vrcp.f32 %v1093_v58  ;;  %1655 = vmatprep.subr.bf16.mxu1 %v1654_v54 }
0x1192   :  { %1657 = vmatpush3.bf16.msra.mxu1 %v1654_v54 }
0x1198   :  { %v1778_v59 = vpop.eup %1777 }
0x1199   :  { %v1780_v61 = vpop.eup %1779  ;;  %v1106_v5 = vmul.f32 %v1778_v59, %v1102_v1  ;;  %v1443_v1 = vld [vmem:[%s2097_s3 + $0x20] ss:$0 sm:$0xff] }
0x119a   :  { %v1107_v6 = vmul.f32 %v1780_v61, %v1103_v3 }
0x11fc   :  { %v1111_v60 = vpop.permute.xlu1 %1110 }
0x11fd   :  { %v1113_v62 = vpop.permute.xlu0 %1112  ;;  %v1116_v63 = vmul.f32 %v1778_v59, %v1111_v60 }
0x11fe   :  { %v1117_v0 = vmul.f32 %v1780_v61, %v1113_v62 }
0x11ff   :  { %1120 = vrot.lane.b32.xlu1 %v1116_v63, %s1832_s9 }
0x1200   :  { %1122 = vrot.lane.b32.xlu0 %v1117_v0, %s1832_s9 }
0x1271   :  { %v1121_v8 = vpop.permute.xlu1 %1120 }
0x1272   :  { %v1123_v9 = vpop.permute.xlu0 %1122  ;;  %v1126_v10 = vadd.f32 %v1121_v8, %v1106_v5 }
0x1273   :  { %v1127_v11 = vadd.f32 %v1123_v9, %v1107_v6 }
0x1274   :  { %1781 = vtanh.f32 %v1126_v10  ;;  %v1242_v41 = vrot.slane %v1126_v10, 7 }
0x1275   :  { %1783 = vtanh.f32 %v1127_v11 }
0x127e   :  { %v1782_v12 = vpop.eup %1781 }
0x127f   :  { %v1784_v13 = vpop.eup %1783  ;;  %1132 = vrot.lane.b32.xlu1 %v1782_v12, %s1831_s2 }
0x1280   :  { %1134 = vrot.lane.b32.xlu0 %v1784_v13, %s1831_s2 }
0x12f1   :  { %v1133_v4 = vpop.permute.xlu1 %1132 }
0x12f2   :  { %v1135_v2 = vpop.permute.xlu0 %1134  ;;  %v1138_v7 = vmul.f32 %v1778_v59, %v1133_v4 }
0x12f3   :  { %v1139_v14 = vmul.f32 %v1780_v61, %v1135_v2 }
0x12f4   :  { %v1142_v15 = vrot.slane %v1138_v7, 6  ;;  %v2046_v16 = vsel %vm1300_vm9, %v1298_v40, %v1138_v7 }
0x12f5   :  { %v1143_v17 = vrot.slane %v1139_v14, 5  ;;  %v2048_v20 = vsel %vm1300_vm9, %v1299_v42, %v1139_v14  ;;  %v1243_v42 = vrot.slane %v1127_v11, 7 }
0x12f7   :  { %v1144_v21 = vsel %vm305_vm2, %v1143_v17, %v1142_v15 }
0x12f8   :  { %1145 = vrot.lane.b32.xlu1 %v1144_v21, %s1832_s9 }
0x136a   :  { %v1146_v22 = vpop.permute.xlu1 %1145 }
0x136b   :  { %1586 = vmatmul.mubr.msk.f32.vlgmr.msra.gmra.mrb[8].mxu0 %vm174_vm3, %v1146_v22 }
0x143e   :  { %v1215_v23 = vpop.f32.mrb[8].mxu0 }
0x143f   :  { %v1220_v24 = vrot.slane %v1215_v23, 1  ;;  %v1221_v25 = vrot.slane %v1215_v23, 2  ;;  %v1587_v26 = vpop.f32.mrb[9].mxu0 }
0x1441   :  { %v1224_v27 = vadd.f32 %v1220_v24, %v1922_v49  ;;  %v1225_v28 = vadd.f32 %v1221_v25, %v1924_v51 }
0x1443   :  { %1785 = vtanh.f32 %v1224_v27  ;;  %v1439_v31 = vmul.f32 -1.442695, %v1224_v27  ;;  %v1440_v32 = vmul.f32 -1.442695, %v1225_v28 }
0x1444   :  { %1787 = vtanh.f32 %v1225_v28 }
0x1445   :  { %1789 = vpow2.f32 %v1439_v31 }
0x1446   :  { %1791 = vpow2.f32 %v1440_v32 }
0x144d   :  { %v1786_v29 = vpop.eup %1785 }
0x144e   :  { %v1788_v30 = vpop.eup %1787  ;;  %1250 = vrot.lane.b32.xlu0 %v1786_v29, %s1831_s2 }
0x144f   :  { %1252 = vrot.lane.b32.xlu1 %v1788_v30, %s1831_s2  ;;  %v1790_v33 = vpop.eup %1789 }
0x1450   :  { %v1792_v34 = vpop.eup %1791  ;;  %v1232_v35 = vadd.f32 1.0, %v1790_v33 }
0x1451   :  { %v1233_v36 = vadd.f32 1.0, %v1792_v34 }
0x1452   :  { %1793 = vrcp.f32 %v1232_v35 }
0x1453   :  { %1795 = vrcp.f32 %v1233_v36 }
0x145c   :  { %v1794_v49 = vpop.eup %1793 }
0x145d   :  { %v1796_v37 = vpop.eup %1795  ;;  %v1246_v43 = vmul.f32 %v1794_v49, %v1242_v41 }
0x145e   :  { %v1247_v44 = vmul.f32 %v1796_v37, %v1243_v42 }
0x14c0   :  { %v1251_v51 = vpop.permute.xlu0 %1250 }
0x14c1   :  { %v1253_v38 = vpop.permute.xlu1 %1252  ;;  %v1256_v39 = vmul.f32 %v1794_v49, %v1251_v51 }
0x14c2   :  { %v1257_v40 = vmul.f32 %v1796_v37, %v1253_v38 }
0x14c3   :  { %1260 = vrot.lane.b32.xlu0 %v1256_v39, %s1832_s9 }
0x14c4   :  { %1262 = vrot.lane.b32.xlu1 %v1257_v40, %s1832_s9 }
0x1535   :  { %v1261_v18 = vpop.permute.xlu0 %1260 }
0x1536   :  { %v1263_v19 = vpop.permute.xlu1 %1262  ;;  %v1266_v45 = vadd.f32 %v1261_v18, %v1246_v43 }
0x1537   :  { %v1267_v46 = vadd.f32 %v1263_v19, %v1247_v44 }
0x1538   :  { %1797 = vtanh.f32 %v1266_v45 }
0x1539   :  { %1799 = vtanh.f32 %v1267_v46 }
0x1542   :  { %v1798_v55 = vpop.eup %1797 }
0x1543   :  { %v1800_v56 = vpop.eup %1799  ;;  %1272 = vrot.lane.b32.xlu0 %v1798_v55, %s1831_s2 }
0x1544   :  { %1274 = vrot.lane.b32.xlu1 %v1800_v56, %s1831_s2 }
0x15b5   :  { %v1273_v57 = vpop.permute.xlu0 %1272 }
0x15b6   :  { %v1275_v58 = vpop.permute.xlu1 %1274  ;;  %v1278_v59 = vmul.f32 %v1794_v49, %v1273_v57 }
0x15b7   :  { %v1279_v60 = vmul.f32 %v1796_v37, %v1275_v58 }
0x15b8   :  { %v1304_v61 = vsel %vm1303_vm10, %v2046_v16, %v1278_v59 }
0x15b9   :  { %v1305_v62 = vsel %vm1303_vm10, %v2048_v20, %v1279_v60  ;;  %1308 = vrot.lane.b32.xlu0 %v1304_v61, %s1832_s9 }
0x15ba   :  { %1310 = vrot.lane.b32.xlu1 %v1305_v62, %s1832_s9 }
0x162b   :  { %v1309_v63 = vpop.permute.xlu0 %1308 }
0x162c   :  { %v1311_v0 = vpop.permute.xlu1 %1310  ;;  %1596 = vmatprep.mubr.msk.f32.mxu1 %vm174_vm3, %v1309_v63 }
0x162d   :  { %1597 = vmatmul.mubr.msk.f32.vlgmr.msra.gmra.mrb[8].mxu1 %vm174_vm3, %v1311_v0 }
0x1700   :  { %v1598_v3 = vpop.f32.mrb[8].mxu1 }
0x1701   :  { %v1396_v5 = vadd.f32 %v1598_v3, %v1443_v1  ;;  %v1382_v6 = vpop.f32.mrb[9].mxu1 }
0x1702   :  { %v1395_v8 = vadd.f32 %v1443_v1, %v1382_v6 }
0x1703   :  { %1399 = vst.msk [vmem:[#allocation2 + $0x8] sm:$0xff] %vm1397_vm11, %v1396_v5 }
0x1704   :  { %1398 = vst.msk [vmem:[#allocation2] sm:$0xff] %vm1397_vm11, %v1395_v8 }
0x1705   :  { %1812 = shalt.err (!%p1809_p4)
}
0x1706   :  { %s1813_s3 = scalar_lea.hbm %s2098_s4, 256 }
0x1707   :  { %p1814_p5 = scmp.ne.s32.totalorder %s2098_s4, %s1813_s3  ;;  %p1817_p6 = scmp.lt.u32.totalorder %s1813_s3, %s2098_s4 }
0x1709   :  { %p1819_p7 = pnand %p1817_p6, %p1814_p5 }
0x170b   :  { %1822 = shalt.err (!%p1819_p7)
}
0x170c   :  { %s1834_s29 = smov 128   ;;  %s1835_s30 = smov 8  }
0x170d   :  { %1411 = dma.vmem_to_hbm [thread:$0]  %s1406_s21, 256, %s2098_s4, [#allocation3], %s1834_s29, %s1834_s29, %s1835_s30  }
0x170e   :  { %1823 = dma.done.wait [#allocation3], 256  }
0x170f   :  { %1824 = vsyncadd [#allocation3], 4294967040 }
0x1710   :  { %1415 = vsyncpa [#allocation3], 1 }

</bundles_post_ra>
